<compile_context>
chip_gen: v6e
topology: v6e:2x2x1
jax: 0.10.0
libtpu: 0.0.40
codegen_flags: <defaults>
</compile_context>

<pallas_src>
import jax
import jax.numpy as jnp
import numpy as np
from jax.experimental import pallas as pl
from jax.experimental.pallas import tpu as pltpu


_LANE = 128
_SUBLANE = 8


def _round_up(x, m):
    return ((x + m - 1) // m) * m


def _row_project(f, w):
    """Row-wise dot of f (bt, n_in) with w (1, n_in) -> (bt, 1). VPU mul/add + one XLU reduce."""
    n_in = f.shape[1]
    if n_in > _LANE and n_in % _LANE == 0:
        acc = f[:, 0:_LANE] * w[:, 0:_LANE]
        for c in range(1, n_in // _LANE):
            lo = c * _LANE
            acc = acc + f[:, lo:lo + _LANE] * w[:, lo:lo + _LANE]
        return jnp.sum(acc, axis=1, keepdims=True)
    return jnp.sum(f * w, axis=1, keepdims=True)


def _dal_stats_kernel(fa_ref, fi_ref, wa_ref, wi_ref, stats_ref):
    t = pl.program_id(1)

    # f32 math everywhere (v5e has no bf16 VPU); HBM traffic is set by the input dtype anyway.
    fa = fa_ref[...].astype(jnp.float32)     # (b_tile, n_in)
    fi = fi_ref[...].astype(jnp.float32)
    wa = wa_ref[...].astype(jnp.float32)     # (1, n_in)
    wi = wi_ref[...].astype(jnp.float32)

    vs_a = _row_project(fa, wa)              # (b_tile, 1)
    vs_i = _row_project(fi, wi)

    s_a = jnp.sum(vs_a, axis=0, keepdims=True)            # (1, 1)
    s_i = jnp.sum(vs_i, axis=0, keepdims=True)
    s_aa = jnp.sum(vs_a * vs_a, axis=0, keepdims=True)
    s_ii = jnp.sum(vs_i * vs_i, axis=0, keepdims=True)
    s_ai = jnp.sum(vs_a * vs_i, axis=0, keepdims=True)

    # Lane-dense accumulator: statistic k lives in lane k (replicated across sublanes).
    lane = jax.lax.broadcasted_iota(jnp.int32, (_SUBLANE, _LANE), 1)
    zero = jnp.float32(0.0)
    contrib = (jnp.where(lane == 0, s_a, zero)
               + jnp.where(lane == 1, s_i, zero)
               + jnp.where(lane == 2, s_aa, zero)
               + jnp.where(lane == 3, s_ii, zero)
               + jnp.where(lane == 4, s_ai, zero))

    @pl.when(t == 0)
    def _init():
        stats_ref[...] = jnp.zeros_like(stats_ref)

    stats_ref[...] += contrib


def _default_num_cores():
    try:
        kind = jax.devices()[0].device_kind.lower()
    except Exception:
        return 1
    return 2 if ("v7" in kind or "tpu7" in kind) else 1


def _choose_b_tile(batch, n_in, num_cores, vmem_budget_bytes=24 * 1024 * 1024):
    # 2 feature inputs x 2 pipeline buffers x b_tile x n_in_padded x 4 B must fit the budget.
    n_in_padded = _round_up(max(n_in, _LANE), _LANE)
    max_rows = max(_SUBLANE, vmem_budget_bytes // (2 * 2 * n_in_padded * 4))
    b_tile = min(1024, max_rows)
    rows_per_core = pl.cdiv(batch, num_cores)
    b_tile = min(b_tile, _round_up(rows_per_core, _SUBLANE))
    return max(_SUBLANE, (b_tile // _SUBLANE) * _SUBLANE)


def dal_regularizer(features_age, features_id, w_age, w_id, *, b_tile=None, num_cores=None):
    """features_*: (B, n_in); w_*: (1, n_in) (PyTorch nn.Linear weight layout). Returns (1,) f32."""
    batch, n_in = features_age.shape
    assert features_id.shape == (batch, n_in)
    assert w_age.shape == (1, n_in) and w_id.shape == (1, n_in)

    if num_cores is None:
        num_cores = _default_num_cores()
    if b_tile is None:
        b_tile = _choose_b_tile(batch, n_in, num_cores)

    rows_per_core = pl.cdiv(batch, num_cores)
    tiles_per_core = pl.cdiv(rows_per_core, b_tile)
    padded_b = num_cores * tiles_per_core * b_tile

    if padded_b != batch:
        # Zero rows contribute 0 to every running sum; the real B is used in the epilogue.
        pad = ((0, padded_b - batch), (0, 0))
        features_age = jnp.pad(features_age, pad)
        features_id = jnp.pad(features_id, pad)

    feat_map = lambda c, t: (c * tiles_per_core + t, 0)
    const_map = lambda c, t: (0, 0)     # weights fetched once, VMEM-resident for the whole loop

    stats = pl.pallas_call(
        _dal_stats_kernel,
        out_shape=jax.ShapeDtypeStruct((num_cores * _SUBLANE, _LANE), jnp.float32),
        grid_spec=pltpu.PrefetchScalarGridSpec(
            num_scalar_prefetch=0,
            grid=(num_cores, tiles_per_core),
            in_specs=[
                pl.BlockSpec((b_tile, n_in), feat_map),
                pl.BlockSpec((b_tile, n_in), feat_map),
                pl.BlockSpec((1, n_in), const_map),
                pl.BlockSpec((1, n_in), const_map),
            ],
            out_specs=pl.BlockSpec((_SUBLANE, _LANE), lambda c, t: (c, 0)),
        ),
        compiler_params=pltpu.CompilerParams(
            dimension_semantics=("parallel", "arbitrary"),
            vmem_limit_bytes=32 * 1024 * 1024,
        ),
    )(features_age, features_id, w_age, w_id)

    # O(1) epilogue: combine per-core partial sums and form rho.
    totals = stats.reshape(num_cores, _SUBLANE, _LANE)[:, 0, :].sum(axis=0)   # (128,)
    s_a, s_i, s_aa, s_ii, s_ai = totals[0], totals[1], totals[2], totals[3], totals[4]

    b = jnp.float32(batch)
    mean_a = s_a / b
    mean_i = s_i / b
    cov = s_ai / b - mean_a * mean_i                      # torch .mean(dim=0) of centered product
    var_a = (s_aa - s_a * mean_a) / (b - 1.0)             # unbiased, matches torch .var(dim=0)
    var_i = (s_ii - s_i * mean_i) / (b - 1.0)
    rho = (cov * cov) / ((var_a + 1e-6) * (var_i + 1e-6))
    return rho.reshape(1)


def dal_regularizer_ref(features_age, features_id, w_age, w_id):
    """Float64 NumPy reference matching the PyTorch module."""
    fa = np.asarray(features_age, dtype=np.float64)
    fi = np.asarray(features_id, dtype=np.float64)
    wa = np.asarray(w_age, dtype=np.float64)
    wi = np.asarray(w_id, dtype=np.float64)
    vs_a = fa @ wa.T
    vs_i = fi @ wi.T
    bsz = vs_a.shape[0]
    ca = vs_a - vs_a.mean(axis=0)
    ci = vs_i - vs_i.mean(axis=0)
    cov = (ca * ci).mean(axis=0)
    var_a = (ca ** 2).sum(axis=0) / (bsz - 1)
    var_i = (ci ** 2).sum(axis=0) / (bsz - 1)
    return (cov ** 2 / ((var_a + 1e-6) * (var_i + 1e-6))).reshape(1)


if __name__ == "__main__":
    key = jax.random.PRNGKey(0)

    # --- Test 1: small shapes, auto tiling / core count -------------------------------------
    B, n_in = 8, 32
    k1, k2, k3, k4, k5, k6 = jax.random.split(key, 6)
    fa = jax.random.normal(k1, (B, n_in), dtype=jnp.float32)
    fi = jax.random.normal(k2, (B, n_in), dtype=jnp.float32)
    bound = 1.0 / (n_in ** 0.5)   # nn.Linear-style init U(-1/sqrt(n_in), 1/sqrt(n_in))
    wa = jax.random.uniform(k3, (1, n_in), minval=-bound, maxval=bound, dtype=jnp.float32)
    wi = jax.random.uniform(k4, (1, n_in), minval=-bound, maxval=bound, dtype=jnp.float32)

    rho = dal_regularizer(fa, fi, wa, wi)
    jax.block_until_ready(rho)
    rho_ref = dal_regularizer_ref(fa, fi, wa, wi)
    assert rho.shape == (1,)
    assert np.allclose(np.asarray(rho), rho_ref, rtol=5e-4, atol=1e-6), (rho, rho_ref)

    # --- Test 2: exercises multi-tile accumulation, 2-core split, chunked lane reduce, padding
    B2, n_in2 = 80, 256
    fa2 = jax.random.normal(k5, (B2, n_in2), dtype=jnp.float32)
    fi2 = jax.random.normal(k6, (B2, n_in2), dtype=jnp.float32)
    bound2 = 1.0 / (n_in2 ** 0.5)
    wa2 = jax.random.uniform(k3, (1, n_in2), minval=-bound2, maxval=bound2, dtype=jnp.float32)
    wi2 = jax.random.uniform(k4, (1, n_in2), minval=-bound2, maxval=bound2, dtype=jnp.float32)

    rho2 = dal_regularizer(fa2, fi2, wa2, wi2, b_tile=32, num_cores=2)
    jax.block_until_ready(rho2)
    rho2_ref = dal_regularizer_ref(fa2, fi2, wa2, wi2)
    assert rho2.shape == (1,)
    assert np.allclose(np.asarray(rho2), rho2_ref, rtol=5e-4, atol=1e-6), (rho2, rho2_ref)

    print("KERNEL_OK")
</pallas_src>

<mosaic_0001>
module attributes {stable_mosaic.version = 11 : i64} {
  func.func @_dal_stats_kernel(%arg0: i32, %arg1: i32, %arg2: memref<8x32xf32, #tpu.memory_space<vmem>>, %arg3: memref<8x32xf32, #tpu.memory_space<vmem>>, %arg4: memref<1x32xf32, #tpu.memory_space<vmem>>, %arg5: memref<1x32xf32, #tpu.memory_space<vmem>>, %arg6: memref<8x128xf32, #tpu.memory_space<vmem>>) attributes {dimension_semantics = [#tpu.dimension_semantics<parallel>, #tpu.dimension_semantics<arbitrary>], iteration_bounds = array<i64: 1, 1>, scalar_prefetch = 0 : i64, scratch_operands = 0 : i64, tpu.core_type = #tpu.core_type<tc>, window_params = [{transform_indices = @transform_0, window_bounds = array<i64: 8, 32>}, {transform_indices = @transform_1, window_bounds = array<i64: 8, 32>}, {pipeline_mode = #tpu.pipeline_mode<synchronous>, transform_indices = @transform_2, window_bounds = array<i64: 1, 32>}, {pipeline_mode = #tpu.pipeline_mode<synchronous>, transform_indices = @transform_3, window_bounds = array<i64: 1, 32>}, {transform_indices = @transform_4, window_bounds = array<i64: 8, 128>}]} {
    %c0 = arith.constant 0 : index
    %c0_0 = arith.constant 0 : index
    %0 = vector.load %arg2[%c0, %c0_0] : memref<8x32xf32, #tpu.memory_space<vmem>>, vector<8x32xf32>
    %c0_1 = arith.constant 0 : index
    %c0_2 = arith.constant 0 : index
    %1 = vector.load %arg3[%c0_1, %c0_2] : memref<8x32xf32, #tpu.memory_space<vmem>>, vector<8x32xf32>
    %c0_3 = arith.constant 0 : index
    %c0_4 = arith.constant 0 : index
    %2 = vector.load %arg4[%c0_3, %c0_4] : memref<1x32xf32, #tpu.memory_space<vmem>>, vector<1x32xf32>
    %c0_5 = arith.constant 0 : index
    %c0_6 = arith.constant 0 : index
    %3 = vector.load %arg5[%c0_5, %c0_6] : memref<1x32xf32, #tpu.memory_space<vmem>>, vector<1x32xf32>
    %4 = vector.broadcast %2 : vector<1x32xf32> to vector<8x32xf32>
    %5 = arith.mulf %0, %4 : vector<8x32xf32>
    %cst = arith.constant dense<0.000000e+00> : vector<8xf32>
    %6 = vector.multi_reduction <add>, %5, %cst [1] : vector<8x32xf32> to vector<8xf32>
    %7 = vector.shape_cast %6 : vector<8xf32> to vector<8x1xf32>
    %8 = vector.broadcast %3 : vector<1x32xf32> to vector<8x32xf32>
    %9 = arith.mulf %1, %8 : vector<8x32xf32>
    %cst_7 = arith.constant dense<0.000000e+00> : vector<8xf32>
    %10 = vector.multi_reduction <add>, %9, %cst_7 [1] : vector<8x32xf32> to vector<8xf32>
    %11 = vector.shape_cast %10 : vector<8xf32> to vector<8x1xf32>
    %cst_8 = arith.constant dense<0.000000e+00> : vector<1xf32>
    %12 = vector.multi_reduction <add>, %7, %cst_8 [0] : vector<8x1xf32> to vector<1xf32>
    %13 = vector.shape_cast %12 : vector<1xf32> to vector<1x1xf32>
    %cst_9 = arith.constant dense<0.000000e+00> : vector<1xf32>
    %14 = vector.multi_reduction <add>, %11, %cst_9 [0] : vector<8x1xf32> to vector<1xf32>
    %15 = vector.shape_cast %14 : vector<1xf32> to vector<1x1xf32>
    %16 = arith.mulf %7, %7 : vector<8x1xf32>
    %cst_10 = arith.constant dense<0.000000e+00> : vector<1xf32>
    %17 = vector.multi_reduction <add>, %16, %cst_10 [0] : vector<8x1xf32> to vector<1xf32>
    %18 = vector.shape_cast %17 : vector<1xf32> to vector<1x1xf32>
    %19 = arith.mulf %11, %11 : vector<8x1xf32>
    %cst_11 = arith.constant dense<0.000000e+00> : vector<1xf32>
    %20 = vector.multi_reduction <add>, %19, %cst_11 [0] : vector<8x1xf32> to vector<1xf32>
    %21 = vector.shape_cast %20 : vector<1xf32> to vector<1x1xf32>
    %22 = arith.mulf %7, %11 : vector<8x1xf32>
    %cst_12 = arith.constant dense<0.000000e+00> : vector<1xf32>
    %23 = vector.multi_reduction <add>, %22, %cst_12 [0] : vector<8x1xf32> to vector<1xf32>
    %24 = vector.shape_cast %23 : vector<1xf32> to vector<1x1xf32>
    %25 = tpu.iota {dimensions = array<i32: 1>} : vector<8x128xi32>
    %c0_i32 = arith.constant 0 : i32
    %26 = vector.broadcast %c0_i32 : i32 to vector<8x128xi32>
    %27 = arith.cmpi eq, %25, %26 : vector<8x128xi32>
    %cst_13 = arith.constant 0.000000e+00 : f32
    %28 = vector.shape_cast %13 : vector<1x1xf32> to vector<1x1xf32>
    %29 = vector.broadcast %28 : vector<1x1xf32> to vector<8x128xf32>
    %30 = vector.broadcast %cst_13 : f32 to vector<8x128xf32>
    %31 = arith.select %27, %29, %30 : vector<8x128xi1>, vector<8x128xf32>
    %c1_i32 = arith.constant 1 : i32
    %32 = vector.broadcast %c1_i32 : i32 to vector<8x128xi32>
    %33 = arith.cmpi eq, %25, %32 : vector<8x128xi32>
    %cst_14 = arith.constant 0.000000e+00 : f32
    %34 = vector.shape_cast %15 : vector<1x1xf32> to vector<1x1xf32>
    %35 = vector.broadcast %34 : vector<1x1xf32> to vector<8x128xf32>
    %36 = vector.broadcast %cst_14 : f32 to vector<8x128xf32>
    %37 = arith.select %33, %35, %36 : vector<8x128xi1>, vector<8x128xf32>
    %38 = arith.addf %31, %37 : vector<8x128xf32>
    %c2_i32 = arith.constant 2 : i32
    %39 = vector.broadcast %c2_i32 : i32 to vector<8x128xi32>
    %40 = arith.cmpi eq, %25, %39 : vector<8x128xi32>
    %cst_15 = arith.constant 0.000000e+00 : f32
    %41 = vector.shape_cast %18 : vector<1x1xf32> to vector<1x1xf32>
    %42 = vector.broadcast %41 : vector<1x1xf32> to vector<8x128xf32>
    %43 = vector.broadcast %cst_15 : f32 to vector<8x128xf32>
    %44 = arith.select %40, %42, %43 : vector<8x128xi1>, vector<8x128xf32>
    %45 = arith.addf %38, %44 : vector<8x128xf32>
    %c3_i32 = arith.constant 3 : i32
    %46 = vector.broadcast %c3_i32 : i32 to vector<8x128xi32>
    %47 = arith.cmpi eq, %25, %46 : vector<8x128xi32>
    %cst_16 = arith.constant 0.000000e+00 : f32
    %48 = vector.shape_cast %21 : vector<1x1xf32> to vector<1x1xf32>
    %49 = vector.broadcast %48 : vector<1x1xf32> to vector<8x128xf32>
    %50 = vector.broadcast %cst_16 : f32 to vector<8x128xf32>
    %51 = arith.select %47, %49, %50 : vector<8x128xi1>, vector<8x128xf32>
    %52 = arith.addf %45, %51 : vector<8x128xf32>
    %c4_i32 = arith.constant 4 : i32
    %53 = vector.broadcast %c4_i32 : i32 to vector<8x128xi32>
    %54 = arith.cmpi eq, %25, %53 : vector<8x128xi32>
    %cst_17 = arith.constant 0.000000e+00 : f32
    %55 = vector.shape_cast %24 : vector<1x1xf32> to vector<1x1xf32>
    %56 = vector.broadcast %55 : vector<1x1xf32> to vector<8x128xf32>
    %57 = vector.broadcast %cst_17 : f32 to vector<8x128xf32>
    %58 = arith.select %54, %56, %57 : vector<8x128xi1>, vector<8x128xf32>
    %59 = arith.addf %52, %58 : vector<8x128xf32>
    %c0_i32_18 = arith.constant 0 : i32
    %60 = arith.cmpi eq, %arg1, %c0_i32_18 : i32
    %61 = arith.extui %60 : i1 to i32
    %c0_i32_19 = arith.constant 0 : i32
    %62 = arith.cmpi ne, %61, %c0_i32_19 : i32
    scf.if %62 {
      %cst_24 = arith.constant 0.000000e+00 : f32
      %66 = vector.broadcast %cst_24 : f32 to vector<8x128xf32>
      %c0_25 = arith.constant 0 : index
      %c0_26 = arith.constant 0 : index
      %67 = vector.load %arg6[%c0_25, %c0_26] : memref<8x128xf32, #tpu.memory_space<vmem>>, vector<8x128xf32>
      tpu.vector_store %arg6[%c0_25, %c0_26], %66 {strides = array<i32>} : memref<8x128xf32, #tpu.memory_space<vmem>>, vector<8x128xf32>,
    } else {
    }
    %c0_20 = arith.constant 0 : index
    %c0_21 = arith.constant 0 : index
    %63 = vector.load %arg6[%c0_20, %c0_21] : memref<8x128xf32, #tpu.memory_space<vmem>>, vector<8x128xf32>
    %64 = arith.addf %63, %59 : vector<8x128xf32>
    %c0_22 = arith.constant 0 : index
    %c0_23 = arith.constant 0 : index
    %65 = vector.load %arg6[%c0_22, %c0_23] : memref<8x128xf32, #tpu.memory_space<vmem>>, vector<8x128xf32>
    tpu.vector_store %arg6[%c0_22, %c0_23], %64 {strides = array<i32>} : memref<8x128xf32, #tpu.memory_space<vmem>>, vector<8x128xf32>,
    return
  }
  func.func @transform_0(%arg0: i32, %arg1: i32) -> (i32, i32) {
    %c1_i32 = arith.constant 1 : i32
    %0 = arith.muli %arg0, %c1_i32 : i32
    %1 = arith.addi %0, %arg1 : i32
    %c0_i32 = arith.constant 0 : i32
    %c0_i32_0 = arith.constant 0 : i32
    return %1, %c0_i32 : i32, i32
  }
  func.func @transform_1(%arg0: i32, %arg1: i32) -> (i32, i32) {
    %c1_i32 = arith.constant 1 : i32
    %0 = arith.muli %arg0, %c1_i32 : i32
    %1 = arith.addi %0, %arg1 : i32
    %c0_i32 = arith.constant 0 : i32
    %c0_i32_0 = arith.constant 0 : i32
    return %1, %c0_i32 : i32, i32
  }
  func.func @transform_2(%arg0: i32, %arg1: i32) -> (i32, i32) {
    %c0_i32 = arith.constant 0 : i32
    %c0_i32_0 = arith.constant 0 : i32
    %c0_i32_1 = arith.constant 0 : i32
    return %c0_i32, %c0_i32_0 : i32, i32
  }
  func.func @transform_3(%arg0: i32, %arg1: i32) -> (i32, i32) {
    %c0_i32 = arith.constant 0 : i32
    %c0_i32_0 = arith.constant 0 : i32
    %c0_i32_1 = arith.constant 0 : i32
    return %c0_i32, %c0_i32_0 : i32, i32
  }
  func.func @transform_4(%arg0: i32, %arg1: i32) -> (i32, i32) {
    %c0_i32 = arith.constant 0 : i32
    %c0_i32_0 = arith.constant 0 : i32
    return %arg0, %c0_i32 : i32, i32
  }
}

</mosaic_0001>

<bundles_post_ra>
// kernel: tpu_custom_call.1
= control target key start
LH: loop header
LB: loop body
LE: loop exit
PB: predicated region body
PF: predicated region fallthrough
CT: control target
= control target key end

     0   :  { %9 = vsyncpa [#allocation3], 0  ;;  %s263_s0 = inlined_call_operand.hbm [shape: f32[8,32], index: 0, kind: input, shape index: {}]   ;;  %s264_s1 = inlined_call_operand.hbm [shape: f32[8,32], index: 1, kind: input, shape index: {}]   ;;  %s265_s2 = inlined_call_operand.vmem [shape: f32[1,32], index: 2, kind: input, shape index: {}]   ;;  %s266_s3 = inlined_call_operand.vmem [shape: f32[1,32], index: 3, kind: input, shape index: {}]   ;;  %s267_s4 = inlined_call_operand.hbm [shape: f32[8,128], index: 4, kind: output, shape index: {}]  }
   0x1   :  { %10 = vsyncpa [#allocation6], 0 }
   0x2   :  { %11 = vsyncpa [#allocation4], 0  ;;  %s220_s15 = smov [#allocation2]   ;;  %s221_s17 = smov [#allocation5]  }
   0x3   :  { %s21_s16 = sshll.u32 %s220_s15, 4  ;;  %s34_s18 = sshll.u32 %s221_s17, 4  ;;  %s22_s16 = int_to_ptr.vmem [resolvable:$true] %s21_s16  ;;  %s35_s18 = int_to_ptr.vmem [resolvable:$true] %s34_s18 }
   0x4   :  { %s162_s19 = scalar_lea.vmem %s22_s16, 128  ;;  %p167_p1 = scmp.lt.s32.totalorder %s22_s16, %s22_s16 }
   0x5   :  { %p163_p0 = scmp.ne.s32.totalorder %s22_s16, %s162_s19  ;;  %p168_p2 = scmp.lt.s32.totalorder %s162_s19, %s162_s19 }
   0x7   :  { %p169_p3 = por %p168_p2, %p167_p1 }
   0x9   :  { %p170_p4 = pnand %p169_p3, %p163_p0 }
   0xb   :  { %173 = shalt.err (!%p170_p4)
}
   0xc   :  { %24 = dma.hbm_to_vmem [thread:$0]  %s263_s0, 128, %s22_s16, [#allocation3]  }
   0xd   :  { %s182_s22 = scalar_lea.vmem %s35_s18, 128  ;;  %p187_p6 = scmp.lt.s32.totalorder %s35_s18, %s35_s18 }
   0xe   :  { %p183_p5 = scmp.ne.s32.totalorder %s35_s18, %s182_s22  ;;  %p188_p7 = scmp.lt.s32.totalorder %s182_s22, %s182_s22 }
  0x10   :  { %p189_p8 = por %p188_p7, %p187_p6 }
  0x12   :  { %p190_p9 = pnand %p189_p8, %p183_p5 }
  0x14   :  { %193 = shalt.err (!%p190_p9)
}
  0x15   :  { %37 = dma.hbm_to_vmem [thread:$0]  %s264_s1, 128, %s35_s18, [#allocation6]  }
  0x16   :  { %214 = dma.done.wait [#allocation3], 128  }
  0x17   :  { %215 = vsyncadd [#allocation3], 4294967168 }
  0x18   :  { %216 = dma.done.wait [#allocation6], 128  }
  0x19   :  { %217 = vsyncadd [#allocation6], 4294967168  ;;  %v50_v0 = vld [vmem:[#allocation2] sm:$0xff]  ;;  %vm61_vm0 = vcmask 261120   ;;  %v51_v2 = vld [vmem:[#allocation5] sm:$0xff]  ;;  %v108_v18 = vlaneseq  ;;  %s222_s1 = smov [#allocation7]  }
  0x1a   :  { %v148_v1 = vld [vmem:[%s265_s2] ss:$0 sm:$0xff]  ;;  %s138_s2 = sshll.u32 %s222_s1, 4  ;;  %s139_s2 = int_to_ptr.vmem [resolvable:$true] %s138_s2 }
  0x1b   :  { %v60_v3 = vmul.f32 %v148_v1, %v50_v0  ;;  %v149_v4 = vld [vmem:[%s266_s3] ss:$0 sm:$0xff]  ;;  %v109_v29 = vand.u32 127, %v108_v18  ;;  %s194_s3 = scalar_lea.vmem %s139_s2, 128  ;;  %p199_p11 = scmp.lt.s32.totalorder %s139_s2, %s139_s2 }
  0x1c   :  { %v71_v5 = vmul.f32 %v149_v4, %v51_v2  ;;  %p195_p10 = scmp.ne.s32.totalorder %s139_s2, %s194_s3  ;;  %p200_p12 = scmp.lt.s32.totalorder %s194_s3, %s194_s3 }
  0x1d   :  { %v62_v6 = vsel %vm61_vm0, %v60_v3, 0.0  ;;  %vm110_vm1 = vcmp.eq.s32.totalorder %v109_v29, 0  ;;  %vm112_vm2 = vcmp.eq.s32.totalorder %v109_v29, 1  ;;  %vm115_vm3 = vcmp.eq.s32.totalorder %v109_v29, 2 }
  0x1e   :  { %63 = vadd.xlane.f32.xlu0 %v62_v6  ;;  %v72_v7 = vsel %vm61_vm0, %v71_v5, 0.0  ;;  %vm118_vm4 = vcmp.eq.s32.totalorder %v109_v29, 3  ;;  %vm121_vm5 = vcmp.eq.s32.totalorder %v109_v29, 4  ;;  %p201_p13 = por %p200_p12, %p199_p11 }
  0x20   :  { %p202_p0 = pnand %p201_p13, %p195_p10 }
  0x22   :  { %73 = vadd.xlane.f32.xlu0 %v72_v7 }
  0xa7   :  { %v64_v8 = vpop.xlane.xlu0 %63 }
  0xa8   :  { %v75_v9 = vrot.slane %v64_v8, 4  ;;  %v87_v10 = vmul.f32 %v64_v8, %v64_v8 }
  0xaa   :  { %v76_v11 = vadd.f32 %v75_v9, %v64_v8  ;;  %v88_v12 = vrot.slane %v87_v10, 4 }
  0xab   :  { %v74_v13 = vpop.xlane.xlu0 %73 }
  0xac   :  { %v77_v14 = vrot.slane %v76_v11, 2  ;;  %v89_v15 = vadd.f32 %v88_v12, %v87_v10  ;;  %v81_v16 = vrot.slane %v74_v13, 4  ;;  %v94_v17 = vmul.f32 %v74_v13, %v74_v13 }
  0xad   :  { %v101_v19 = vmul.f32 %v74_v13, %v64_v8 }
  0xae   :  { %v78_v20 = vadd.f32 %v77_v14, %v76_v11  ;;  %v90_v21 = vrot.slane %v89_v15, 2  ;;  %v82_v22 = vadd.f32 %v81_v16, %v74_v13  ;;  %v95_v23 = vrot.slane %v94_v17, 4 }
  0xaf   :  { %v102_v24 = vrot.slane %v101_v19, 4 }
  0xb0   :  { %v79_v25 = vrot.slane %v78_v20, 1  ;;  %v91_v26 = vadd.f32 %v90_v21, %v89_v15  ;;  %v83_v27 = vrot.slane %v82_v22, 2  ;;  %v96_v28 = vadd.f32 %v95_v23, %v94_v17 }
  0xb1   :  { %v103_v30 = vadd.f32 %v102_v24, %v101_v19 }
  0xb2   :  { %v92_v31 = vrot.slane %v91_v26, 1  ;;  %v84_v32 = vadd.f32 %v83_v27, %v82_v22  ;;  %v97_v33 = vrot.slane %v96_v28, 2  ;;  %v80_v35 = vadd.f32 %v79_v25, %v78_v20 }
  0xb3   :  { %v104_v34 = vrot.slane %v103_v30, 2 }
  0xb4   :  { %v85_v36 = vrot.slane %v84_v32, 1  ;;  %v98_v37 = vadd.f32 %v97_v33, %v96_v28  ;;  %v93_v39 = vadd.f32 %v92_v31, %v91_v26  ;;  %v111_v43 = vsel %vm110_vm1, %v80_v35, 0.0 }
  0xb5   :  { %v105_v38 = vadd.f32 %v104_v34, %v103_v30 }
  0xb6   :  { %v86_v40 = vadd.f32 %v85_v36, %v84_v32  ;;  %v99_v41 = vrot.slane %v98_v37, 1  ;;  %v116_v47 = vsel %vm115_vm3, %v93_v39, 0.0 }
  0xb7   :  { %v106_v42 = vrot.slane %v105_v38, 1 }
  0xb8   :  { %v100_v44 = vadd.f32 %v99_v41, %v98_v37  ;;  %v113_v45 = vsel %vm112_vm2, %v86_v40, 0.0 }
  0xb9   :  { %v114_v46 = vadd.f32 %v113_v45, %v111_v43  ;;  %v107_v48 = vadd.f32 %v106_v42, %v105_v38 }
  0xba   :  { %v119_v50 = vsel %vm118_vm4, %v100_v44, 0.0 }
  0xbb   :  { %v117_v49 = vadd.f32 %v116_v47, %v114_v46  ;;  %v122_v52 = vsel %vm121_vm5, %v107_v48, 0.0 }
  0xbd   :  { %v120_v51 = vadd.f32 %v119_v50, %v117_v49 }
  0xbf   :  { %v123_v53 = vadd.f32 %v122_v52, %v120_v51 }
  0xc1   :  { %131 = vst [vmem:[#allocation7] sm:$0xff] %v123_v53 }
  0xc2   :  { %205 = shalt.err (!%p202_p0)
}
  0xc3   :  { %141 = dma.vmem_to_hbm [thread:$0]  %s139_s2, 128, %s267_s4, [#allocation4]  }
  0xc4   :  { %218 = dma.done.wait [#allocation4], 128  }
  0xc5   :  { %219 = vsyncadd [#allocation4], 4294967168 }
  0xc6   :  { %145 = vsyncpa [#allocation3], 1 }
  0xc7   :  { %146 = vsyncpa [#allocation6], 1 }
  0xc8   :  { %147 = vsyncpa [#allocation4], 1 }

</bundles_post_ra>
